<compile_context>
chip_gen: v7x
topology: tpu7x:2x2x1
jax: 0.10.0
libtpu: 0.0.40
codegen_flags: <defaults>
</compile_context>

<pallas_src>
import functools

import jax
import jax.numpy as jnp
from jax.experimental import pallas as pl
from jax.experimental.pallas import tpu as pltpu


# ---------------------------------------------------------------------------
# In-kernel helpers
# ---------------------------------------------------------------------------

def _mlp_mask(avg_c, max_c, w1_ref, b1_ref, w2_ref, b2_ref):
    """sigmoid(fus(avg) + fus(max)) with both fus() calls fused into a single
    2-column matmul pair.  avg_c/max_c: (C, 1) f32 -> returns (C, 1) f32.

    Biases stay (C//2,1)/(C,1) (sublane-major) because this matmul orientation
    yields the mask directly as (C, 1) with no final transpose.
    """
    w1 = w1_ref[...].astype(jnp.float32)     # (C//2, C)
    b1 = b1_ref[...].astype(jnp.float32)     # (C//2, 1)
    w2 = w2_ref[...].astype(jnp.float32)     # (C,    C//2)
    b2 = b2_ref[...].astype(jnp.float32)     # (C,    1)

    v2 = jnp.concatenate([avg_c, max_c], axis=1)                    # (C, 2)
    h = jnp.dot(w1, v2, preferred_element_type=jnp.float32) + b1    # (C//2, 2)
    h = jnp.maximum(h, 0.0)                                         # ReLU
    z = jnp.dot(w2, h, preferred_element_type=jnp.float32) + b2     # (C, 2)
    return jax.nn.sigmoid(z[:, 0:1] + z[:, 1:2])                    # (C, 1)


# ---------------------------------------------------------------------------
# Kernels
# ---------------------------------------------------------------------------

def _ca_fused_kernel(x_ref, w1_ref, b1_ref, w2_ref, b2_ref, o_ref, *, inv_hw):
    # x stays in its native dtype; only the (C,1) pooled stats are f32.
    x = x_ref[0]                                                     # (C, HW)
    sum_c = jnp.sum(x, axis=1, keepdims=True, dtype=jnp.float32)     # f32 acc
    max_c = jnp.max(x, axis=1, keepdims=True).astype(jnp.float32)
    c_mask = _mlp_mask(sum_c * inv_hw, max_c,
                       w1_ref, b1_ref, w2_ref, b2_ref)               # (C, 1)
    # Broadcast multiply in the input dtype (mask cast down, not x cast up).
    o_ref[0] = (x * c_mask.astype(x.dtype)).astype(o_ref.dtype)


def _ca_reduce_kernel(x_ref, w1_ref, b1_ref, w2_ref, b2_ref, mask_ref,
                      sum_sc, max_sc, *, inv_hw):
    k = pl.program_id(1)

    @pl.when(k == 0)
    def _():
        sum_sc[...] = jnp.zeros_like(sum_sc)
        max_sc[...] = jnp.full_like(max_sc, -jnp.inf)

    x = x_ref[0]                                                     # (C, T)
    sum_sc[...] += jnp.sum(x, axis=1, keepdims=True, dtype=jnp.float32)
    max_sc[...] = jnp.maximum(
        max_sc[...], jnp.max(x, axis=1, keepdims=True).astype(jnp.float32))

    @pl.when(k == pl.num_programs(1) - 1)
    def _():
        mask_ref[0] = _mlp_mask(sum_sc[...] * inv_hw, max_sc[...],
                                w1_ref, b1_ref, w2_ref, b2_ref)      # (C, 1)


def _ca_apply_kernel(x_ref, mask_ref, o_ref):
    x = x_ref[0]                                                     # (C, T)
    m = mask_ref[0]                                                  # (C, 1) f32
    o_ref[0] = (x * m.astype(x.dtype)).astype(o_ref.dtype)


# ---------------------------------------------------------------------------
# Wrappers
# ---------------------------------------------------------------------------

def _vmem_capacity_bytes():
    try:
        return int(pltpu.get_tpu_info().vmem_capacity_bytes)
    except Exception:
        return 64 * 1024 * 1024   # conservative: v7x per-core VMEM


def _pick_hw_tile(HW, C, dtype_bytes, budget):
    """Largest multiple of 128 dividing HW whose working set fits the budget."""
    best = None
    for cand in range(128, HW, 128):
        if HW % cand:
            continue
        if 4 * C * cand * dtype_bytes + (2 << 20) <= budget:
            best = cand
    return best


def _ca_fused(x, w1, b1c, w2, b2c, *, vmem_limit):
    N, C, HW = x.shape
    Ch = w1.shape[0]
    dtype_bytes = jnp.dtype(x.dtype).itemsize
    kernel = functools.partial(_ca_fused_kernel, inv_hw=1.0 / HW)
    return pl.pallas_call(
        kernel,
        out_shape=jax.ShapeDtypeStruct((N, C, HW), x.dtype),
        grid_spec=pltpu.PrefetchScalarGridSpec(
            num_scalar_prefetch=0,
            grid=(N,),
            in_specs=[
                pl.BlockSpec((1, C, HW), lambda n: (n, 0, 0)),
                pl.BlockSpec((Ch, C), lambda n: (0, 0)),
                pl.BlockSpec((Ch, 1), lambda n: (0, 0)),
                pl.BlockSpec((C, Ch), lambda n: (0, 0)),
                pl.BlockSpec((C, 1), lambda n: (0, 0)),
            ],
            out_specs=pl.BlockSpec((1, C, HW), lambda n: (n, 0, 0)),
        ),
        compiler_params=pltpu.CompilerParams(
            dimension_semantics=("parallel",),
            vmem_limit_bytes=vmem_limit),
        cost_estimate=pl.CostEstimate(
            flops=2 * N * C * HW + 8 * N * C * Ch,
            transcendentals=2 * N * C,
            bytes_accessed=2 * N * C * HW * dtype_bytes),
    )(x, w1, b1c, w2, b2c)


def _ca_two_phase(x, w1, b1c, w2, b2c, *, hw_tile, vmem_limit):
    N, C, HW = x.shape
    Ch = w1.shape[0]
    nt = HW // hw_tile
    dtype_bytes = jnp.dtype(x.dtype).itemsize

    # Phase 1: pooled sum/max over HW tiles -> sigmoid channel mask (N, C, 1).
    reduce_kernel = functools.partial(_ca_reduce_kernel, inv_hw=1.0 / HW)
    mask = pl.pallas_call(
        reduce_kernel,
        out_shape=jax.ShapeDtypeStruct((N, C, 1), jnp.float32),
        grid_spec=pltpu.PrefetchScalarGridSpec(
            num_scalar_prefetch=0,
            grid=(N, nt),
            in_specs=[
                pl.BlockSpec((1, C, hw_tile), lambda n, k: (n, 0, k)),
                pl.BlockSpec((Ch, C), lambda n, k: (0, 0)),
                pl.BlockSpec((Ch, 1), lambda n, k: (0, 0)),
                pl.BlockSpec((C, Ch), lambda n, k: (0, 0)),
                pl.BlockSpec((C, 1), lambda n, k: (0, 0)),
            ],
            out_specs=pl.BlockSpec((1, C, 1), lambda n, k: (n, 0, 0)),
            scratch_shapes=[pltpu.VMEM((C, 1), jnp.float32),
                            pltpu.VMEM((C, 1), jnp.float32)],
        ),
        compiler_params=pltpu.CompilerParams(
            dimension_semantics=("parallel", "arbitrary"),
            vmem_limit_bytes=vmem_limit),
        cost_estimate=pl.CostEstimate(
            flops=2 * N * C * HW + 8 * N * C * Ch,
            transcendentals=2 * N * C,
            bytes_accessed=N * C * HW * dtype_bytes),
    )(x, w1, b1c, w2, b2c)

    # Phase 2: lane-dense broadcast multiply, parallel over both grid axes.
    out = pl.pallas_call(
        _ca_apply_kernel,
        out_shape=jax.ShapeDtypeStruct((N, C, HW), x.dtype),
        grid_spec=pltpu.PrefetchScalarGridSpec(
            num_scalar_prefetch=0,
            grid=(N, nt),
            in_specs=[
                pl.BlockSpec((1, C, hw_tile), lambda n, k: (n, 0, k)),
                pl.BlockSpec((1, C, 1), lambda n, k: (n, 0, 0)),
            ],
            out_specs=pl.BlockSpec((1, C, hw_tile), lambda n, k: (n, 0, k)),
        ),
        compiler_params=pltpu.CompilerParams(
            dimension_semantics=("parallel", "parallel"),
            vmem_limit_bytes=vmem_limit),
        cost_estimate=pl.CostEstimate(
            flops=N * C * HW,
            transcendentals=0,
            bytes_accessed=2 * N * C * HW * dtype_bytes),
    )(x, mask)
    return out


def ca_forward(x_nchw, w1, b1, w2, b2, *, force_two_phase=False, hw_tile=None):
    """x_nchw: (N, C, H, W). Returns (N, C, H, W), same dtype as x."""
    N, C, H, W = x_nchw.shape
    HW = H * W
    x = x_nchw.reshape(N, C, HW)
    Ch = w1.shape[0]
    b1c = b1.reshape(Ch, 1)
    b2c = b2.reshape(C, 1)

    dtype_bytes = jnp.dtype(x.dtype).itemsize
    capacity = _vmem_capacity_bytes()
    budget = int(0.70 * capacity)               # headroom for regalloc etc.

    weight_bytes = 4 * (w1.size + b1.size + w2.size + b2.size)
    image_bytes = C * HW * dtype_bytes
    # input + output blocks, each double-buffered by the pipeline, + slack
    fused_need = 4 * image_bytes + 2 * weight_bytes + (2 << 20)

    use_fused = (not force_two_phase) and fused_need <= budget
    if use_fused:
        out = _ca_fused(
            x, w1, b1c, w2, b2c,
            vmem_limit=int(min(capacity, max(fused_need, 16 << 20))))
    else:
        T = hw_tile if hw_tile is not None else _pick_hw_tile(
            HW, C, dtype_bytes, budget)
        if T is None or HW % T != 0:
            # No clean HW tiling available -> fall back to the fused path.
            out = _ca_fused(
                x, w1, b1c, w2, b2c,
                vmem_limit=int(min(capacity, max(fused_need, 16 << 20))))
        else:
            tile_need = 4 * C * T * dtype_bytes + 2 * weight_bytes + (2 << 20)
            out = _ca_two_phase(
                x, w1, b1c, w2, b2c, hw_tile=T,
                vmem_limit=int(min(capacity, max(tile_need, 16 << 20))))
    return out.reshape(N, C, H, W)


# ---------------------------------------------------------------------------
# Pure-JAX reference (mirrors the PyTorch forward)
# ---------------------------------------------------------------------------

def ca_reference(x, w1, b1, w2, b2):
    xf = x.astype(jnp.float32)
    avg_c = jnp.mean(xf, axis=(2, 3))                 # (N, C)
    max_c = jnp.max(xf, axis=(2, 3))                  # (N, C)

    def fus(v):                                       # v: (N, C)
        h = jnp.maximum(v @ w1.T + b1, 0.0)           # (N, C//2)
        return h @ w2.T + b2                          # (N, C)

    mask = jax.nn.sigmoid(fus(avg_c) + fus(max_c))    # (N, C)
    return (xf * mask[:, :, None, None]).astype(x.dtype)


if __name__ == "__main__":
    key = jax.random.PRNGKey(0)
    N, C, H, W = 2, 4, 16, 16

    kx, kw1, kb1, kw2, kb2 = jax.random.split(key, 5)
    x = jax.random.normal(kx, (N, C, H, W), dtype=jnp.float32)

    # Conv2d(C, C//2, 1) squeezed to (C//2, C); Conv2d(C//2, C, 1) -> (C, C//2)
    w1 = jax.random.normal(kw1, (C // 2, C), dtype=jnp.float32) * 0.5
    b1 = jax.random.normal(kb1, (C // 2,), dtype=jnp.float32) * 0.1
    w2 = jax.random.normal(kw2, (C, C // 2), dtype=jnp.float32) * 0.5
    b2 = jax.random.normal(kb2, (C,), dtype=jnp.float32) * 0.1

    ref = ca_reference(x, w1, b1, w2, b2)

    # Path 1: fused single-pass kernel (auto-selected at this small size).
    out_fused = ca_forward(x, w1, b1, w2, b2)
    jax.block_until_ready(out_fused)
    assert out_fused.shape == (N, C, H, W)
    assert jnp.allclose(out_fused, ref, atol=1e-5, rtol=1e-5), \
        "fused path mismatch vs reference"

    # Path 2: force the HW-tiled two-phase path (reduce + apply) so the
    # large-feature-map / v7x code path is also compiled and verified.
    out_tiled = ca_forward(x, w1, b1, w2, b2, force_two_phase=True, hw_tile=128)
    jax.block_until_ready(out_tiled)
    assert out_tiled.shape == (N, C, H, W)
    assert jnp.allclose(out_tiled, ref, atol=1e-5, rtol=1e-5), \
        "two-phase path mismatch vs reference"

    print("KERNEL_OK")
</pallas_src>

<mosaic_0001>
module attributes {stable_mosaic.version = 11 : i64} {
  func.func @_ca_fused_kernel(%arg0: i32, %arg1: memref<1x4x256xf32, #tpu.memory_space<vmem>>, %arg2: memref<2x4xf32, #tpu.memory_space<vmem>>, %arg3: memref<2x1xf32, #tpu.memory_space<vmem>>, %arg4: memref<4x2xf32, #tpu.memory_space<vmem>>, %arg5: memref<4x1xf32, #tpu.memory_space<vmem>>, %arg6: memref<1x4x256xf32, #tpu.memory_space<vmem>>) attributes {dimension_semantics = [#tpu.dimension_semantics<parallel>], iteration_bounds = array<i64: 2>, scalar_prefetch = 0 : i64, scratch_operands = 0 : i64, tpu.core_type = #tpu.core_type<tc>, window_params = [{transform_indices = @transform_0, window_bounds = array<i64: 1, 4, 256>}, {pipeline_mode = #tpu.pipeline_mode<synchronous>, transform_indices = @transform_1, window_bounds = array<i64: 2, 4>}, {pipeline_mode = #tpu.pipeline_mode<synchronous>, transform_indices = @transform_2, window_bounds = array<i64: 2, 1>}, {pipeline_mode = #tpu.pipeline_mode<synchronous>, transform_indices = @transform_3, window_bounds = array<i64: 4, 2>}, {pipeline_mode = #tpu.pipeline_mode<synchronous>, transform_indices = @transform_4, window_bounds = array<i64: 4, 1>}, {transform_indices = @transform_5, window_bounds = array<i64: 1, 4, 256>}]} {
    %c0 = arith.constant 0 : index
    %c0_0 = arith.constant 0 : index
    %c0_1 = arith.constant 0 : index
    %0 = vector.load %arg1[%c0, %c0_0, %c0_1] : memref<1x4x256xf32, #tpu.memory_space<vmem>>, vector<1x4x256xf32>
    %1 = vector.shape_cast %0 : vector<1x4x256xf32> to vector<4x256xf32>
    %cst = arith.constant dense<0.000000e+00> : vector<4xf32>
    %2 = vector.multi_reduction <add>, %1, %cst [1] : vector<4x256xf32> to vector<4xf32>
    %3 = vector.shape_cast %2 : vector<4xf32> to vector<4x1xf32>
    %cst_2 = arith.constant dense<0xFF800000> : vector<4xf32>
    %4 = vector.multi_reduction <maximumf>, %1, %cst_2 [1] : vector<4x256xf32> to vector<4xf32>
    %5 = vector.shape_cast %4 : vector<4xf32> to vector<4x1xf32>
    %cst_3 = arith.constant 3.906250e-03 : f32
    %6 = vector.broadcast %cst_3 : f32 to vector<4x1xf32>
    %7 = arith.mulf %3, %6 : vector<4x1xf32>
    %c0_4 = arith.constant 0 : index
    %c0_5 = arith.constant 0 : index
    %8 = vector.load %arg2[%c0_4, %c0_5] : memref<2x4xf32, #tpu.memory_space<vmem>>, vector<2x4xf32>
    %c0_6 = arith.constant 0 : index
    %c0_7 = arith.constant 0 : index
    %9 = vector.load %arg3[%c0_6, %c0_7] : memref<2x1xf32, #tpu.memory_space<vmem>>, vector<2x1xf32>
    %c0_8 = arith.constant 0 : index
    %c0_9 = arith.constant 0 : index
    %10 = vector.load %arg4[%c0_8, %c0_9] : memref<4x2xf32, #tpu.memory_space<vmem>>, vector<4x2xf32>
    %c0_10 = arith.constant 0 : index
    %c0_11 = arith.constant 0 : index
    %11 = vector.load %arg5[%c0_10, %c0_11] : memref<4x1xf32, #tpu.memory_space<vmem>>, vector<4x1xf32>
    %12 = tpu.concatenate %7, %5 in 1 : vector<4x1xf32>, vector<4x1xf32> -> vector<4x2xf32>
    %cst_12 = arith.constant dense<0.000000e+00> : vector<2x2xf32>
    %13 = tpu.matmul %8, %12, %cst_12 {dimension_numbers = #tpu.dot_dimension_numbers<[1], [0], [0], [1], [0, 0, 1, 1], [], []>} : vector<2x4xf32>, vector<4x2xf32>, vector<2x2xf32> -> vector<2x2xf32>
    %14 = vector.broadcast %9 : vector<2x1xf32> to vector<2x2xf32>
    %15 = arith.addf %13, %14 : vector<2x2xf32>
    %cst_13 = arith.constant 0.000000e+00 : f32
    %16 = vector.broadcast %cst_13 : f32 to vector<2x2xf32>
    %17 = arith.maximumf %15, %16 : vector<2x2xf32>
    %cst_14 = arith.constant dense<0.000000e+00> : vector<4x2xf32>
    %18 = tpu.matmul %10, %17, %cst_14 {dimension_numbers = #tpu.dot_dimension_numbers<[1], [0], [0], [1], [0, 0, 1, 1], [], []>} : vector<4x2xf32>, vector<2x2xf32>, vector<4x2xf32> -> vector<4x2xf32>
    %19 = vector.broadcast %11 : vector<4x1xf32> to vector<4x2xf32>
    %20 = arith.addf %18, %19 : vector<4x2xf32>
    %21 = vector.extract_strided_slice %20 {offsets = [0, 0], sizes = [4, 1], strides = [1, 1]} : vector<4x2xf32> to vector<4x1xf32>
    %22 = vector.extract_strided_slice %20 {offsets = [0, 1], sizes = [4, 1], strides = [1, 1]} : vector<4x2xf32> to vector<4x1xf32>
    %23 = arith.addf %21, %22 : vector<4x1xf32>
    %24 = arith.negf %23 : vector<4x1xf32>
    %25 = math.exp %24 : vector<4x1xf32>
    %cst_15 = arith.constant 1.000000e+00 : f32
    %26 = vector.broadcast %cst_15 : f32 to vector<4x1xf32>
    %27 = arith.addf %26, %25 : vector<4x1xf32>
    %28 = arith.divf %26, %27 : vector<4x1xf32>
    %29 = vector.broadcast %28 : vector<4x1xf32> to vector<4x256xf32>
    %30 = arith.mulf %1, %29 : vector<4x256xf32>
    %c0_16 = arith.constant 0 : index
    %c0_17 = arith.constant 0 : index
    %c0_18 = arith.constant 0 : index
    %31 = vector.load %arg6[%c0_16, %c0_17, %c0_18] : memref<1x4x256xf32, #tpu.memory_space<vmem>>, vector<1x4x256xf32>
    %32 = vector.shape_cast %31 : vector<1x4x256xf32> to vector<4x256xf32>
    %33 = vector.shape_cast %30 : vector<4x256xf32> to vector<1x4x256xf32>
    tpu.vector_store %arg6[%c0_16, %c0_17, %c0_18], %33 {strides = array<i32>} : memref<1x4x256xf32, #tpu.memory_space<vmem>>, vector<1x4x256xf32>,
    return
  }
  func.func @transform_0(%arg0: i32) -> (i32, i32, i32) {
    %c0_i32 = arith.constant 0 : i32
    %c0_i32_0 = arith.constant 0 : i32
    %c0_i32_1 = arith.constant 0 : i32
    return %arg0, %c0_i32, %c0_i32_0 : i32, i32, i32
  }
  func.func @transform_1(%arg0: i32) -> (i32, i32) {
    %c0_i32 = arith.constant 0 : i32
    %c0_i32_0 = arith.constant 0 : i32
    %c0_i32_1 = arith.constant 0 : i32
    return %c0_i32, %c0_i32_0 : i32, i32
  }
  func.func @transform_2(%arg0: i32) -> (i32, i32) {
    %c0_i32 = arith.constant 0 : i32
    %c0_i32_0 = arith.constant 0 : i32
    %c0_i32_1 = arith.constant 0 : i32
    return %c0_i32, %c0_i32_0 : i32, i32
  }
  func.func @transform_3(%arg0: i32) -> (i32, i32) {
    %c0_i32 = arith.constant 0 : i32
    %c0_i32_0 = arith.constant 0 : i32
    %c0_i32_1 = arith.constant 0 : i32
    return %c0_i32, %c0_i32_0 : i32, i32
  }
  func.func @transform_4(%arg0: i32) -> (i32, i32) {
    %c0_i32 = arith.constant 0 : i32
    %c0_i32_0 = arith.constant 0 : i32
    %c0_i32_1 = arith.constant 0 : i32
    return %c0_i32, %c0_i32_0 : i32, i32
  }
  func.func @transform_5(%arg0: i32) -> (i32, i32, i32) {
    %c0_i32 = arith.constant 0 : i32
    %c0_i32_0 = arith.constant 0 : i32
    %c0_i32_1 = arith.constant 0 : i32
    return %arg0, %c0_i32, %c0_i32_0 : i32, i32, i32
  }
}

</mosaic_0001>

<bundles_post_ra>
// kernel: tpu_custom_call.1
= control target key start
LH: loop header
LB: loop body
LE: loop exit
PB: predicated region body
PF: predicated region fallthrough
CT: control target
= control target key end

     0   :  { %10 = vsyncpa [#allocation3], 0  ;;  %s956_s0 = inlined_call_operand.hbm [shape: f32[2,4,256], index: 0, kind: input, shape index: {}]   ;;  %s957_s1 = inlined_call_operand.vmem [shape: f32[2,4], index: 1, kind: input, shape index: {}]   ;;  %s958_s2 = inlined_call_operand.vmem [shape: f32[2,1], index: 2, kind: input, shape index: {}]   ;;  %s959_s3 = inlined_call_operand.vmem [shape: f32[4,2], index: 3, kind: input, shape index: {}]   ;;  %s960_s4 = inlined_call_operand.vmem [shape: f32[4,1], index: 4, kind: input, shape index: {}]   ;;  %s961_s5 = inlined_call_operand.hbm [shape: f32[2,4,256], index: 5, kind: output, shape index: {}]  }
   0x1   :  { %12 = vsyncpa [#allocation3 + $0x1], 0 }
   0x2   :  { %13 = vsyncpa [#allocation4], 0 }
   0x3   :  { %15 = vsyncpa [#allocation4 + $0x1], 0  ;;  %s767_s18 = smov 0   ;;  %s769_s19 = smov 0  }
   0x4   :  { %s771_s20 = smov 0   ;;  %s773_s21 = smov 0  }
   0x5 LB: > { %s788_s22 = sadd.s32 4294967295, %s728_s21   ;;  %s539_s23 = sadd.s32 4294967294, %s728_s21   ;;  %s728_s21 = sphi %s773_s21, %s976_s21   ;;  %s724_s20 = sphi %s771_s20, %s975_s20   ;;  %s720_s19 = sphi %s769_s19, %s974_s19   ;;  %s716_s18 = sphi %s767_s18, %s973_s18  }
   0x6   : > { %s792_s24 = sadd.s32 1, %s728_s21   ;;  %s28_s25 = sadd.s32 1, %s724_s20 }
   0x7   : > { %s25_s26 = ssub.s32 %s728_s21, %s792_s24  ;;  %p35_p0 = scmp.ne.s32.totalorder %s724_s20, %s720_s19 }
   0x8   : > { %p26_p1 = scmp.eq.s32.totalorder %s25_s26, 0  ;;  %p36_p2 = scmp.eq.s32.totalorder %s728_s21, 0 }
   0x9   : > { %p41_p3 = scmp.ne.s32.totalorder %s720_s19, %s716_s18  ;;  %p42_p4 = scmp.eq.s32.totalorder %s788_s22, 0 }
   0xa   : > { %s804_s27 = scalar_select %p26_p1, %s724_s20, %s28_s25  }
   0xb   : > { %p806_p5 = por %p36_p2, %p35_p0  ;;  %p810_p6 = por %p42_p4, %p41_p3 }
   0xc   : > { %p149_p7 = scmp.eq.s32.totalorder %s788_s22, 1  ;;  %p155_p8 = scmp.eq.s32.totalorder %s539_s23, 1 }
   0xd   : > { %p586_p10 = scmp.lt.s32.totalorder %s728_s21, 2  ;;  %s187_s7 = sand.u32 1, %s724_s20  }
   0xe   : > { %p817_p11 = por %p149_p7, %p35_p0  ;;  %p821_p12 = por %p155_p8, %p41_p3 }
   0xf   : > { %s558_s8 = sshll.u32 %s728_s21, 7  ;;  %s542_s9 = sshll.u32 %s187_s7, 3 }
  0x10   : > { %s965_s30 = scalar_select %p817_p11, 1, 0 }
  0x11   : > { %s966_s6 = scalar_select %p821_p12, 1, 0 }
  0x12   : > { %s830_s12 = scalar_lea.hbm %s956_s0, %s558_s8  ;;  %s191_s13 = scalar_lea.vmem [#allocation2], %s542_s9 }
  0x13   : > { %s199_s14 = sshll.u32 %s191_s13, 4  ;;  %p834_p13 = pnand %p586_p10, %p806_p5  ;;  %s838_s14 = int_to_ptr.vmem [resolvable:$true] %s199_s14 }
  0x14   : > { %s188_s16 = scalar_lea.sflag [#allocation3], %s187_s7  ;;  %s632_s17 = scalar_lea.hbm %s830_s12, 128 }
  0x15   : > { %p633_p2 = scmp.ne.s32.totalorder %s830_s12, %s632_s17  ;;  %p634_p3 = pneg %p834_p13 }
  0x16   : > { %s637_s26 = scalar_lea.hbm %s956_s0, 256  ;;  %p638_p5 = scmp.lt.u32.totalorder %s830_s12, %s956_s0 }
  0x17   : > { %p635_p4 = pnand %p634_p3, %p633_p2  ;;  %p639_p8 = scmp.lt.u32.totalorder %s637_s26, %s632_s17 }
  0x18   : > { %p641_p9 = scmp.lt.u32.totalorder %s632_s17, %s830_s12 }
  0x19   : > { %p636_p7 = pneg %p635_p4  ;;  %p640_p10 = por %p639_p8, %p638_p5 }
  0x1b   : > { %p642_p0 = por %p641_p9, %p640_p10 }
  0x1d   : > { %p643_p1 = pnand %p642_p0, %p636_p7 }
  0x1f   : > { %646 = shalt.err (!%p643_p1)
}
  0x20   : > { %s647_s7 = scalar_lea.vmem %s838_s14, 128  ;;  %s730_s9 = smov [#allocation2]  }
  0x21   : > { %p648_p2 = scmp.ne.s32.totalorder %s838_s14, %s647_s7  ;;  %s652_s10 = sshll.u32 %s730_s9, 4  ;;  %s653_s10 = int_to_ptr.vmem [resolvable:$false] %s652_s10 }
  0x22   : > { %s654_s11 = scalar_lea.vmem %s653_s10, 256  ;;  %p655_p11 = scmp.lt.s32.totalorder %s838_s14, %s653_s10 }
  0x23   : > { %p650_p4 = pnand %p648_p2, %p634_p3  ;;  %p656_p5 = scmp.lt.s32.totalorder %s654_s11, %s647_s7 }
  0x25   : > { %p651_p12 = pneg %p650_p4  ;;  %p657_p8 = por %p656_p5, %p655_p11 }
  0x27   : > { %p658_p9 = pnand %p657_p8, %p651_p12 }
  0x29   : > { %661 = shalt.err (!%p658_p9)
}
  0x2a   : > { %581 = dma.hbm_to_vmem [thread:$0]  (!%p834_p13), %s830_s12, 128, %s838_s14, %s188_s16  }
  0x2b   : > { %p968_p0 = scmp.lt.s32.totalorder %s728_s21, 3  ;;  %p969_p1 = scmp.ge.s32.totalorder %s728_s21, 1 }
  0x2d   : > { %p205_p3 = pnand %p969_p1, %p968_p0 }
  0x2e   : > { %s872_s13 = sand.u32 (!%p205_p3), 1, %s720_s19  }
  0x2f   : > { %208 = sbr.rel (%p205_p3) target bundleno = 929 (0x3a1), region = 40  ;;  %s546_s17 = sshll.u32 (!%p205_p3), %s872_s13, 3 }
  0x30   : > { %s211_s23 = scalar_lea.sflag (!%p205_p3), [#allocation3], %s872_s13  ;;  %s214_s15 = scalar_lea.vmem (!%p205_p3), [#allocation2], %s546_s17 }
  0x36   : > { %707 = dma.done.wait (%p810_p6), %s211_s23, 128  }
  0x37   : > { %709 = vsyncadd (%p810_p6), %s211_s23, 4294967168  ;;  %vm245_vm0 = vcmask 1043456   ;;  %v882_v0 = vld [vmem:[%s214_s15] sm:$0xff]  ;;  %v731_v8 = vmov 0.0   ;;  %vm732_vm1 = vmmov 0   ;;  %v733_v10 = vmov 0  }
  0x38   : > { %v243_v1 = vcombine.high %v882_v0, %v882_v0  ;;  %v246_v2 = vsel %vm245_vm0, %v882_v0, 0.0  ;;  %v251_v4 = vsel %vm245_vm0, %v882_v0, -inf  ;;  %564 = vmatprep.subr.mxu0 %v731_v8  ;;  %569 = vmatprep.subr.mxu1 %v731_v8  ;;  %v258_v9 = vld [vmem:[%s958_s2] sm:$0x3]  ;;  %vm261_vm2 = vcmask 7168   ;;  %s734_s7 = smov 127  }
  0x39   : > { %566 = vmatprep.mubr.msk.f32.mxu0 %vm732_vm1, %v731_v8  ;;  %571 = vmatprep.mubr.msk.f32.mxu1 %vm732_vm1, %v731_v8  ;;  %v260_v11 = vld [vmem:[%s960_s4] sm:$0xf]  ;;  %vm268_vm3 = vcmask 31744   ;;  %vm355_vm4 = vcmask 1041408   ;;  %vm351_vm5 = vcmask 15360   ;;  %v447_v35 = vlaneseq  ;;  %s559_s9 = sshll.u32 %s788_s22, 7 }
  0x3a   : > { %v247_v3 = vsel %vm245_vm0, %v243_v1, 0.0  ;;  %v252_v5 = vsel %vm245_vm0, %v243_v1, -inf  ;;  %625 = vset.pattern.permute.xlu1 %v733_v10  ;;  %626 = vset.pattern.permute.xlu0 %v733_v10  ;;  %v257_v15 = vld [vmem:[%s957_s1] sm:$0x3]  ;;  %v735_v33 = vmov 839922192   ;;  %s912_s29 = scalar_lea.hbm %s961_s5, %s559_s9 }
  0x3b   : > { %v248_v6 = vadd.f32 %v247_v3, %v246_v2  ;;  %v253_v7 = vmax.f32 %v251_v4, %v252_v5  ;;  %265 = vperm.xlu1 %625, %v258_v9   ;;  %v259_v22 = vld [vmem:[%s959_s3] sm:$0xf]  ;;  %v445_v34 = vunpack.c.l.s4 %v735_v33  ;;  %v448_v37 = vshrl.u32 %v447_v35, 7  ;;  %s240_s10 = scalar_lea.vmem [#allocation5], %s546_s17  ;;  %s455_s12 = scalar_lea.sflag [#allocation4], %s872_s13 }
  0x3c   : > { %s469_s11 = sshll.u32 %s240_s10, 4  ;;  %p970_p11 = scmp.ne.s32.totalorder %s965_s30, 0  ;;  %s914_s11 = int_to_ptr.vmem [resolvable:$true] %s469_s11 }
  0x3d   : > { %249 = vadd.xlane.f32.xlu0 %v248_v6  ;;  %v446_v36 = vunpack.c.0.s8 %v445_v34  ;;  %s662_s14 = scalar_lea.vmem %s914_s11, 128  ;;  %s736_s22 = smov [#allocation5]  }
  0x3e   : > { %p663_p6 = scmp.ne.s32.totalorder %s914_s11, %s662_s14  ;;  %s666_s17 = sshll.u32 %s736_s22, 4  ;;  %s667_s17 = int_to_ptr.vmem [resolvable:$false] %s666_s17 }
  0x3f   : > { %348 = vperm.xlu1 %625, %v260_v11   ;;  %v449_v38 = vsub.s32 %v446_v36, %v448_v37  ;;  %s668_s16 = scalar_lea.vmem %s667_s17, 256  ;;  %p669_p7 = scmp.lt.s32.totalorder %s914_s11, %s667_s17 }
  0x40   : > { %p664_p12 = pnand %p663_p6, %p970_p11  ;;  %p670_p10 = scmp.lt.s32.totalorder %s668_s16, %s662_s14 }
  0x41   : > { %254 = vmax.xlane.f32.xlu0 %v253_v7 }
  0x42   : > { %p665_p13 = pneg %p664_p12  ;;  %p671_p2 = por %p670_p10, %p669_p7 }
  0x44   : > { %p672_p4 = pnand %p671_p2, %p665_p13 }
  0xba   : > { %v266_v17 = vpop.permute.xlu1 %265 }
  0xbe   : > { %v349_v23 = vpop.permute.xlu1 %348 }
  0xca   : > { %v250_v12 = vpop.xlane.xlu0 %249 }
  0xcb   : > { %v256_v13 = vmul.f32 0.00390625, %v250_v12 }
  0xce   : > { %v255_v14 = vpop.xlane.xlu0 %254 }
  0xcf   : > { %v262_v16 = vsel %vm261_vm2, %v256_v13, %v255_v14 }
  0xd0   : > { %565 = vmatpush3.msk.msra.mxu0 %vm245_vm0, %v262_v16 }
  0xd1   : > { %567 = vmatmul.mubr.msk.f32.vlgmr.msra.gmra.mrb[0].mxu0 %vm268_vm3, %v257_v15 }
 0x1a4   : > { %v341_v18 = vpop.f32.mrb[0].mxu0 }
 0x1a5   : > { %v342_v19 = vadd.f32 %v341_v18, %v266_v17  ;;  %v568_v20 = vpop.f32.mrb[1].mxu0 }
 0x1a7   : > { %v345_v21 = vmax.f32 %v342_v19, 0.0 }
 0x1a9   : > { %570 = vmatpush3.msk.msra.mxu1 %vm355_vm4, %v345_v21 }
 0x1aa   : > { %572 = vmatmul.mubr.msk.f32.vlgmr.msra.gmra.mrb[0].mxu1 %vm351_vm5, %v259_v22 }
 0x27d   : > { %v425_v24 = vpop.f32.mrb[0].mxu1 }
 0x27e   : > { %v426_v25 = vadd.f32 %v425_v24, %v349_v23  ;;  %v573_v26 = vpop.f32.mrb[1].mxu1 }
 0x280   : > { %430 = vrot.lane.b32.xlu0 %v426_v25, %s734_s7 }
 0x2f2   : > { %v431_v27 = vpop.permute.xlu0 %430 }
 0x2f3   : > { %v433_v28 = vadd.f32 %v431_v27, %v426_v25 }
 0x2f5   : > { %v552_v29 = vmul.f32 -1.442695, %v433_v28 }
 0x2f7   : > { %628 = vpow2.f32 %v552_v29 }
 0x301   : > { %v629_v30 = vpop.eup %628 }
 0x302   : > { %v437_v31 = vadd.f32 1.0, %v629_v30 }
 0x304   : > { %630 = vrcp.f32 %v437_v31 }
 0x30e   : > { %v631_v32 = vpop.eup %630 }
 0x30f   : > { %442 = vperm.xlu1 %625, %v631_v32  }
 0x38e   : > { %v443_v39 = vpop.permute.xlu1 %442 }
 0x38f   : > { %v450_v40 = vrot.slane %v443_v39, %v449_v38 }
 0x391   : > { %v452_v41 = vmul.f32 %v450_v40, %v882_v0 }
 0x393   : > { %453 = vst [vmem:[%s240_s10] sm:$0xff] %v452_v41 }
 0x394   : > { %675 = shalt.err (!%p672_p4)
}
 0x395   : > { %s676_s13 = scalar_lea.hbm %s912_s29, 128  ;;  %s680_s28 = scalar_lea.hbm %s961_s5, 256 }
 0x396   : > { %p677_p5 = scmp.ne.s32.totalorder %s912_s29, %s676_s13  ;;  %p681_p0 = scmp.lt.u32.totalorder %s912_s29, %s961_s5 }
 0x397   : > { %p682_p1 = scmp.lt.u32.totalorder %s680_s28, %s676_s13  ;;  %p684_p6 = scmp.lt.u32.totalorder %s676_s13, %s912_s29 }
 0x398   : > { %p678_p8 = pnand %p677_p5, %p970_p11 }
 0x399   : > { %p683_p3 = por %p682_p1, %p681_p0 }
 0x39a   : > { %p679_p9 = pneg %p678_p8 }
 0x39b   : > { %p685_p12 = por %p684_p6, %p683_p3 }
 0x39d   : > { %p686_p13 = pnand %p685_p12, %p679_p9 }
 0x39f   : > { %689 = shalt.err (!%p686_p13)
}
 0x3a0   : > { %576 = dma.vmem_to_hbm [thread:$0]  (%p970_p11), %s914_s11, 128, %s912_s29, %s455_s12  }
 0x3a1 PF: > { %s481_s9 = sand.u32 1, %s716_s18   ;;  %p971_p7 = scmp.ne.s32.totalorder %s966_s6, 0 }
 0x3a2   : > { %p972_p10 = scmp.ge.s32.totalorder %s728_s21, 2  ;;  %s482_s10 = scalar_lea.sflag [#allocation4], %s481_s9 }
 0x3a4   : > { %p583_p2 = pnand %p972_p10, %p971_p7 }
 0x3a6   : > { %711 = dma.done.wait (!%p583_p2), %s482_s10, 128  }
 0x3a7   : > { %713 = vsyncadd (!%p583_p2), %s482_s10, 4294967168  ;;  %p18_p4 = scmp.ge.s32.totalorder %s792_s24, 4   ;;  %s973_s18 = smov %s720_s19 }
 0x3a8   : > { %s974_s19 = smov %s724_s20  ;;  %s975_s20 = smov %s804_s27 }
 0x3a9   : > { %s976_s21 = smov %s792_s24  ;;  %20 = sbr.rel (!%p18_p4) target bundleno = 5 (0x5), region = 85 }
 0x3b0   :  { %487 = vsyncpa [#allocation3], 1 }
 0x3b1   :  { %489 = vsyncpa [#allocation3 + $0x1], 1 }
 0x3b2   :  { %490 = vsyncpa [#allocation4], 1 }
 0x3b3   :  { %492 = vsyncpa [#allocation4 + $0x1], 1 }

</bundles_post_ra>
